<compile_context>
chip_gen: v7x
topology: tpu7x:2x2x1
jax: 0.10.0
libtpu: 0.0.40
codegen_flags: <defaults>
</compile_context>

<pallas_src>
import jax
import jax.numpy as jnp
from jax.experimental import pallas as pl
from jax.experimental.pallas import tpu as pltpu


# --------------------------------------------------------------------------
# Stage 1: conv1/2/3 (+ folded BN) + ReLU + tiled global max-pool.
# Grid: (B, N_pad // TN).  Output block (1, 1, 1024) is the running max of
# the RAW conv3 matmul output (scale folded into w3; shift+ReLU deferred).
# --------------------------------------------------------------------------
def _stn3d_conv_pool_kernel(x_ref,
                            w1_ref, t1_ref,
                            w2_ref, t2_ref,
                            w3_ref,
                            o_ref):
    k = pl.program_id(1)

    # Reset the running max at the first N-tile of each batch element.  The
    # output block stays resident in VMEM across the whole k axis.
    @pl.when(k == 0)
    def _():
        o_ref[...] = jnp.full_like(o_ref, -jnp.inf)

    # conv1 (1x1, K=3) on the VPU: three broadcast-FMAs into (TN, 64).
    # (A K=3 MXU contraction pads to 128/256 and wastes >97% of each push.)
    x = x_ref[0].astype(jnp.float32)                          # (TN, 3) f32
    h = (x[:, 0:1] * w1_ref[0:1, :]
         + x[:, 1:2] * w1_ref[1:2, :]
         + x[:, 2:3] * w1_ref[2:3, :]
         + t1_ref[...])                                       # (TN, 64) f32
    h = jnp.maximum(h, 0.0).astype(jnp.bfloat16)

    # conv2 (1x1) + bn2 + relu : (TN,64) @ (64,128), bf16 in / f32 accumulate.
    h = jnp.dot(h, w2_ref[...], preferred_element_type=jnp.float32)
    h = jnp.maximum(h + t2_ref[...], 0.0).astype(jnp.bfloat16)  # (TN, 128)

    # conv3 (1x1) : (TN,128) @ (128,1024).  BN scale folded into w3; the
    # shift + ReLU is applied after the max-pool (stage 2) — exact because
    # relu(y + t) is monotone in y per channel.
    h = jnp.dot(h, w3_ref[...], preferred_element_type=jnp.float32)  # (TN,1024)

    # Partial max over this tile's points, folded into the running max.
    o_ref[0] = jnp.maximum(o_ref[0], jnp.max(h, axis=0, keepdims=True))


# --------------------------------------------------------------------------
# Stage 2: deferred conv3 epilogue + FC head, batched over all B.
# --------------------------------------------------------------------------
def _stn3d_head_kernel(g_ref, t3_ref,
                       w4_ref, t4_ref,
                       w5_ref, t5_ref,
                       w6_ref, b6_ref,
                       o_ref):
    # Deferred bn3 shift + relu on the pooled features.
    g = jnp.maximum(g_ref[...] + t3_ref[...], 0.0).astype(jnp.bfloat16)  # (B,1024)

    # fc1 + bn4 + relu (scale folded into w4)
    h = jnp.dot(g, w4_ref[...], preferred_element_type=jnp.float32)
    h = jnp.maximum(h + t4_ref[...], 0.0).astype(jnp.bfloat16)          # (B, 512)

    # fc2 + bn5 + relu (scale folded into w5)
    h = jnp.dot(h, w5_ref[...], preferred_element_type=jnp.float32)
    h = jnp.maximum(h + t5_ref[...], 0.0)                               # (B, 256) f32

    # fc3 (f32) + bias with the flattened 3x3 identity already folded in.
    out = jnp.dot(h, w6_ref[...], preferred_element_type=jnp.float32)
    o_ref[...] = out + b6_ref[...]                                      # (B, 9)


def stn3d_forward(x, params, *, tile_n=2048):
    """x: (B, 3, N) float32 (PyTorch NCW).  Returns (B, 3, 3) float32."""
    B, C, N = x.shape
    assert C == 3

    (w1, s1, t1, w2, s2, t2, w3, s3, t3,
     w4, s4, t4, w5, s5, t5, w6, b6) = params

    # Fold BN scale into the weights in f32 (exact for any sign of gamma),
    # THEN cast to bf16 for the MXU operands.  w1 stays f32 (VPU path).
    w1f = w1 * s1                                  # (3, 64)    f32
    w2b = (w2 * s2).astype(jnp.bfloat16)           # (64, 128)
    w3b = (w3 * s3).astype(jnp.bfloat16)           # (128, 1024)
    w4b = (w4 * s4).astype(jnp.bfloat16)           # (1024, 512)
    w5b = (w5 * s5).astype(jnp.bfloat16)           # (512, 256)

    # Fold the flattened 3x3 identity into the fc3 bias (exact, host-side).
    b6i = b6 + jnp.eye(3, dtype=jnp.float32).reshape(1, 9)

    # ---- points-major layout, host bf16 cast, N tiling ------------------
    x_t = jnp.transpose(x, (0, 2, 1)).astype(jnp.bfloat16)     # (B, N, 3)

    tn = min(int(tile_n), ((N + 7) // 8) * 8)
    tn = max(8, (tn // 8) * 8)                                 # multiple of 8
    n_pad = pl.cdiv(N, tn) * tn
    if n_pad != N:
        # Edge-replicate the last point so padded rows cannot affect the max.
        pad = jnp.broadcast_to(x_t[:, N - 1:N, :], (B, n_pad - N, 3))
        x_t = jnp.concatenate([x_t, pad], axis=1)              # (B, n_pad, 3)

    def rep2(arr):   # broadcast (grid-invariant) spec for the 2-D grid
        return pl.BlockSpec(arr.shape, lambda b, k: (0,) * arr.ndim)

    def rep1(arr):   # broadcast spec for the 1-D grid
        return pl.BlockSpec(arr.shape, lambda i: (0,) * arr.ndim)

    # ---- stage 1: conv stack + global max-pool --------------------------
    pooled = pl.pallas_call(
        _stn3d_conv_pool_kernel,
        out_shape=jax.ShapeDtypeStruct((B, 1, 1024), jnp.float32),
        grid_spec=pltpu.PrefetchScalarGridSpec(
            num_scalar_prefetch=0,
            grid=(B, n_pad // tn),
            in_specs=[
                pl.BlockSpec((1, tn, 3), lambda b, k: (b, k, 0)),   # x
                rep2(w1f), rep2(t1),
                rep2(w2b), rep2(t2),
                rep2(w3b),
            ],
            out_specs=pl.BlockSpec((1, 1, 1024), lambda b, k: (b, 0, 0)),
        ),
        compiler_params=pltpu.CompilerParams(
            dimension_semantics=("parallel", "arbitrary"),
            vmem_limit_bytes=40 * 1024 * 1024),
    )(x_t, w1f, t1, w2b, t2, w3b)

    feats = pooled.reshape(B, 1024)                            # (B, 1024)

    # ---- stage 2: deferred conv3 epilogue + batched FC head -------------
    out = pl.pallas_call(
        _stn3d_head_kernel,
        out_shape=jax.ShapeDtypeStruct((B, 9), jnp.float32),
        grid_spec=pltpu.PrefetchScalarGridSpec(
            num_scalar_prefetch=0,
            grid=(1,),
            in_specs=[
                pl.BlockSpec((B, 1024), lambda i: (0, 0)),     # pooled feats
                rep1(t3),
                rep1(w4b), rep1(t4),
                rep1(w5b), rep1(t5),
                rep1(w6), rep1(b6i),
            ],
            out_specs=pl.BlockSpec((B, 9), lambda i: (0, 0)),
        ),
        compiler_params=pltpu.CompilerParams(
            dimension_semantics=("arbitrary",)),
    )(feats, t3, w4b, t4, w5b, t5, w6, b6i)

    return out.reshape(B, 3, 3)


def init_params(key):
    """Deterministic synthetic parameters (shapes match STN3d.__init__)."""
    eps = 1e-5
    dims = [(3, 64), (64, 128), (128, 1024), (1024, 512), (512, 256), (256, 9)]
    keys = jax.random.split(key, 2 * len(dims))
    params = []
    for i, (din, dout) in enumerate(dims):
        kw, kb = keys[2 * i], keys[2 * i + 1]
        # weight stored as (din, dout) so the kernel does x @ W
        w = jax.random.normal(kw, (din, dout), jnp.float32) * 0.05
        bias = jax.random.normal(kb, (1, dout), jnp.float32) * 0.05
        if i < 5:
            # fold eval-mode BatchNorm (gamma=1, beta=0, mean=0, var=1) + bias
            gamma = jnp.ones((1, dout), jnp.float32)
            beta = jnp.zeros((1, dout), jnp.float32)
            scale = gamma / jnp.sqrt(1.0 + eps)
            shift = bias * scale + beta
            params += [w, scale, shift]
        else:
            params += [w, bias]
    return tuple(params)


def reference_forward(x, params):
    """Pure-JAX reference mirroring the kernel's folded-weight / bf16-operand
    math, written in the module's original op order (relu/shift before the
    max-pool — exactly equivalent to the kernel's deferred epilogue)."""
    (w1, s1, t1, w2, s2, t2, w3, s3, t3,
     w4, s4, t4, w5, s5, t5, w6, b6) = params
    B = x.shape[0]

    w1f = w1 * s1
    w2b = (w2 * s2).astype(jnp.bfloat16)
    w3b = (w3 * s3).astype(jnp.bfloat16)
    w4b = (w4 * s4).astype(jnp.bfloat16)
    w5b = (w5 * s5).astype(jnp.bfloat16)

    xb = jnp.transpose(x, (0, 2, 1)).astype(jnp.bfloat16).astype(jnp.float32)
    # conv1 + bn1 + relu (same FMA formulation as the kernel)
    h = (xb[..., 0:1] * w1f[0] + xb[..., 1:2] * w1f[1]
         + xb[..., 2:3] * w1f[2] + t1)
    h = jnp.maximum(h, 0.0).astype(jnp.bfloat16)
    # conv2 + bn2 + relu
    h = jnp.dot(h, w2b, preferred_element_type=jnp.float32)
    h = jnp.maximum(h + t2, 0.0).astype(jnp.bfloat16)
    # conv3 + bn3 + relu, then global max-pool
    h = jnp.dot(h, w3b, preferred_element_type=jnp.float32)
    h = jnp.maximum(h + t3, 0.0)
    g = jnp.max(h, axis=1).astype(jnp.bfloat16)                # (B, 1024)
    # fc1/fc2 + bn + relu, fc3 in f32
    g = jnp.maximum(jnp.dot(g, w4b, preferred_element_type=jnp.float32) + t4, 0.0)
    g = jnp.maximum(jnp.dot(g.astype(jnp.bfloat16), w5b,
                            preferred_element_type=jnp.float32) + t5, 0.0)
    out = jnp.dot(g, w6, preferred_element_type=jnp.float32) + b6
    iden = jnp.eye(3, dtype=jnp.float32).reshape(1, 9)
    return (out + iden).reshape(B, 3, 3)


if __name__ == "__main__":
    key = jax.random.PRNGKey(0)
    k_x, k_p = jax.random.split(key)

    B, N = 2, 20                                               # batch, num points
    x = jax.random.normal(k_x, (B, 3, N), jnp.float32)         # PyTorch NCW
    params = init_params(k_p)

    y_ref = reference_forward(x, params)

    # Small tile_n: exercises multi-tile running-max + edge padding.
    y_small = jax.block_until_ready(stn3d_forward(x, params, tile_n=8))
    # Default tile_n (clamped to padded N): single-tile fast path.
    y_default = jax.block_until_ready(stn3d_forward(x, params))

    for y in (y_small, y_default):
        assert y.shape == (B, 3, 3)
        assert jnp.allclose(y, y_ref, atol=2e-3, rtol=2e-3), \
            float(jnp.max(jnp.abs(y - y_ref)))

    print("KERNEL_OK")
</pallas_src>

<mosaic_0001>
module attributes {stable_mosaic.version = 11 : i64} {
  func.func @_stn3d_conv_pool_kernel(%arg0: i32, %arg1: i32, %arg2: memref<1x8x3xbf16, #tpu.memory_space<vmem>>, %arg3: memref<3x64xf32, #tpu.memory_space<vmem>>, %arg4: memref<1x64xf32, #tpu.memory_space<vmem>>, %arg5: memref<64x128xbf16, #tpu.memory_space<vmem>>, %arg6: memref<1x128xf32, #tpu.memory_space<vmem>>, %arg7: memref<128x1024xbf16, #tpu.memory_space<vmem>>, %arg8: memref<1x1x1024xf32, #tpu.memory_space<vmem>>) attributes {dimension_semantics = [#tpu.dimension_semantics<parallel>, #tpu.dimension_semantics<arbitrary>], iteration_bounds = array<i64: 2, 3>, scalar_prefetch = 0 : i64, scratch_operands = 0 : i64, tpu.core_type = #tpu.core_type<tc>, window_params = [{transform_indices = @transform_0, window_bounds = array<i64: 1, 8, 3>}, {pipeline_mode = #tpu.pipeline_mode<synchronous>, transform_indices = @transform_1, window_bounds = array<i64: 3, 64>}, {pipeline_mode = #tpu.pipeline_mode<synchronous>, transform_indices = @transform_2, window_bounds = array<i64: 1, 64>}, {pipeline_mode = #tpu.pipeline_mode<synchronous>, transform_indices = @transform_3, window_bounds = array<i64: 64, 128>}, {pipeline_mode = #tpu.pipeline_mode<synchronous>, transform_indices = @transform_4, window_bounds = array<i64: 1, 128>}, {pipeline_mode = #tpu.pipeline_mode<synchronous>, transform_indices = @transform_5, window_bounds = array<i64: 128, 1024>}, {transform_indices = @transform_6, window_bounds = array<i64: 1, 1, 1024>}]} {
    %c0_i32 = arith.constant 0 : i32
    %0 = arith.cmpi eq, %arg1, %c0_i32 : i32
    %1 = arith.extui %0 : i1 to i32
    %c0_i32_0 = arith.constant 0 : i32
    %2 = arith.cmpi ne, %1, %c0_i32_0 : i32
    scf.if %2 {
      %cst_25 = arith.constant 0xFF800000 : f32
      %47 = vector.broadcast %cst_25 : f32 to vector<1x1x1024xf32>
      %c0_26 = arith.constant 0 : index
      %c0_27 = arith.constant 0 : index
      %c0_28 = arith.constant 0 : index
      %48 = vector.load %arg8[%c0_26, %c0_27, %c0_28] : memref<1x1x1024xf32, #tpu.memory_space<vmem>>, vector<1x1x1024xf32>
      tpu.vector_store %arg8[%c0_26, %c0_27, %c0_28], %47 {strides = array<i32>} : memref<1x1x1024xf32, #tpu.memory_space<vmem>>, vector<1x1x1024xf32>,
    } else {
    }
    %c0 = arith.constant 0 : index
    %c0_1 = arith.constant 0 : index
    %c0_2 = arith.constant 0 : index
    %3 = vector.load %arg2[%c0, %c0_1, %c0_2] : memref<1x8x3xbf16, #tpu.memory_space<vmem>>, vector<1x8x3xbf16>
    %4 = vector.shape_cast %3 : vector<1x8x3xbf16> to vector<8x3xbf16>
    %5 = arith.extf %4 : vector<8x3xbf16> to vector<8x3xf32>
    %6 = vector.extract_strided_slice %5 {offsets = [0, 0], sizes = [8, 1], strides = [1, 1]} : vector<8x3xf32> to vector<8x1xf32>
    %c0_3 = arith.constant 0 : index
    %c0_4 = arith.constant 0 : index
    %7 = vector.load %arg3[%c0_3, %c0_4] : memref<3x64xf32, #tpu.memory_space<vmem>>, vector<1x64xf32>
    %8 = vector.broadcast %6 : vector<8x1xf32> to vector<8x64xf32>
    %9 = vector.broadcast %7 : vector<1x64xf32> to vector<8x64xf32>
    %10 = arith.mulf %8, %9 : vector<8x64xf32>
    %11 = vector.extract_strided_slice %5 {offsets = [0, 1], sizes = [8, 1], strides = [1, 1]} : vector<8x3xf32> to vector<8x1xf32>
    %c1 = arith.constant 1 : index
    %c0_5 = arith.constant 0 : index
    %12 = vector.load %arg3[%c1, %c0_5] : memref<3x64xf32, #tpu.memory_space<vmem>>, vector<1x64xf32>
    %13 = vector.broadcast %11 : vector<8x1xf32> to vector<8x64xf32>
    %14 = vector.broadcast %12 : vector<1x64xf32> to vector<8x64xf32>
    %15 = arith.mulf %13, %14 : vector<8x64xf32>
    %16 = arith.addf %10, %15 : vector<8x64xf32>
    %17 = vector.extract_strided_slice %5 {offsets = [0, 2], sizes = [8, 1], strides = [1, 1]} : vector<8x3xf32> to vector<8x1xf32>
    %c2 = arith.constant 2 : index
    %c0_6 = arith.constant 0 : index
    %18 = vector.load %arg3[%c2, %c0_6] : memref<3x64xf32, #tpu.memory_space<vmem>>, vector<1x64xf32>
    %19 = vector.broadcast %17 : vector<8x1xf32> to vector<8x64xf32>
    %20 = vector.broadcast %18 : vector<1x64xf32> to vector<8x64xf32>
    %21 = arith.mulf %19, %20 : vector<8x64xf32>
    %22 = arith.addf %16, %21 : vector<8x64xf32>
    %c0_7 = arith.constant 0 : index
    %c0_8 = arith.constant 0 : index
    %23 = vector.load %arg4[%c0_7, %c0_8] : memref<1x64xf32, #tpu.memory_space<vmem>>, vector<1x64xf32>
    %24 = vector.broadcast %23 : vector<1x64xf32> to vector<8x64xf32>
    %25 = arith.addf %22, %24 : vector<8x64xf32>
    %cst = arith.constant 0.000000e+00 : f32
    %26 = vector.broadcast %cst : f32 to vector<8x64xf32>
    %27 = arith.maximumf %25, %26 : vector<8x64xf32>
    %28 = arith.truncf %27 : vector<8x64xf32> to vector<8x64xbf16>
    %c0_9 = arith.constant 0 : index
    %c0_10 = arith.constant 0 : index
    %29 = vector.load %arg5[%c0_9, %c0_10] : memref<64x128xbf16, #tpu.memory_space<vmem>>, vector<64x128xbf16>
    %cst_11 = arith.constant dense<0.000000e+00> : vector<8x128xf32>
    %30 = tpu.matmul %28, %29, %cst_11 {dimension_numbers = #tpu.dot_dimension_numbers<[1], [0], [0], [1], [0, 0, 1, 1], [], []>} : vector<8x64xbf16>, vector<64x128xbf16>, vector<8x128xf32> -> vector<8x128xf32>
    %c0_12 = arith.constant 0 : index
    %c0_13 = arith.constant 0 : index
    %31 = vector.load %arg6[%c0_12, %c0_13] : memref<1x128xf32, #tpu.memory_space<vmem>>, vector<1x128xf32>
    %32 = vector.broadcast %31 : vector<1x128xf32> to vector<8x128xf32>
    %33 = arith.addf %30, %32 : vector<8x128xf32>
    %cst_14 = arith.constant 0.000000e+00 : f32
    %34 = vector.broadcast %cst_14 : f32 to vector<8x128xf32>
    %35 = arith.maximumf %33, %34 : vector<8x128xf32>
    %36 = arith.truncf %35 : vector<8x128xf32> to vector<8x128xbf16>
    %c0_15 = arith.constant 0 : index
    %c0_16 = arith.constant 0 : index
    %37 = vector.load %arg7[%c0_15, %c0_16] : memref<128x1024xbf16, #tpu.memory_space<vmem>>, vector<128x1024xbf16>
    %cst_17 = arith.constant dense<0.000000e+00> : vector<8x1024xf32>
    %38 = tpu.matmul %36, %37, %cst_17 {dimension_numbers = #tpu.dot_dimension_numbers<[1], [0], [0], [1], [0, 0, 1, 1], [], []>} : vector<8x128xbf16>, vector<128x1024xbf16>, vector<8x1024xf32> -> vector<8x1024xf32>
    %c0_18 = arith.constant 0 : index
    %c0_19 = arith.constant 0 : index
    %c0_20 = arith.constant 0 : index
    %39 = vector.load %arg8[%c0_18, %c0_19, %c0_20] : memref<1x1x1024xf32, #tpu.memory_space<vmem>>, vector<1x1x1024xf32>
    %40 = vector.shape_cast %39 : vector<1x1x1024xf32> to vector<1x1024xf32>
    %cst_21 = arith.constant dense<0xFF800000> : vector<1024xf32>
    %41 = vector.multi_reduction <maximumf>, %38, %cst_21 [0] : vector<8x1024xf32> to vector<1024xf32>
    %42 = vector.shape_cast %41 : vector<1024xf32> to vector<1x1024xf32>
    %43 = arith.maximumf %40, %42 : vector<1x1024xf32>
    %c0_22 = arith.constant 0 : index
    %c0_23 = arith.constant 0 : index
    %c0_24 = arith.constant 0 : index
    %44 = vector.load %arg8[%c0_22, %c0_23, %c0_24] : memref<1x1x1024xf32, #tpu.memory_space<vmem>>, vector<1x1x1024xf32>
    %45 = vector.shape_cast %44 : vector<1x1x1024xf32> to vector<1x1024xf32>
    %46 = vector.shape_cast %43 : vector<1x1024xf32> to vector<1x1x1024xf32>
    tpu.vector_store %arg8[%c0_22, %c0_23, %c0_24], %46 {strides = array<i32>} : memref<1x1x1024xf32, #tpu.memory_space<vmem>>, vector<1x1x1024xf32>,
    return
  }
  func.func @transform_0(%arg0: i32, %arg1: i32) -> (i32, i32, i32) {
    %c0_i32 = arith.constant 0 : i32
    %c0_i32_0 = arith.constant 0 : i32
    return %arg0, %arg1, %c0_i32 : i32, i32, i32
  }
  func.func @transform_1(%arg0: i32, %arg1: i32) -> (i32, i32) {
    %c0_i32 = arith.constant 0 : i32
    %c0_i32_0 = arith.constant 0 : i32
    %c0_i32_1 = arith.constant 0 : i32
    return %c0_i32, %c0_i32_0 : i32, i32
  }
  func.func @transform_2(%arg0: i32, %arg1: i32) -> (i32, i32) {
    %c0_i32 = arith.constant 0 : i32
    %c0_i32_0 = arith.constant 0 : i32
    %c0_i32_1 = arith.constant 0 : i32
    return %c0_i32, %c0_i32_0 : i32, i32
  }
  func.func @transform_3(%arg0: i32, %arg1: i32) -> (i32, i32) {
    %c0_i32 = arith.constant 0 : i32
    %c0_i32_0 = arith.constant 0 : i32
    %c0_i32_1 = arith.constant 0 : i32
    return %c0_i32, %c0_i32_0 : i32, i32
  }
  func.func @transform_4(%arg0: i32, %arg1: i32) -> (i32, i32) {
    %c0_i32 = arith.constant 0 : i32
    %c0_i32_0 = arith.constant 0 : i32
    %c0_i32_1 = arith.constant 0 : i32
    return %c0_i32, %c0_i32_0 : i32, i32
  }
  func.func @transform_5(%arg0: i32, %arg1: i32) -> (i32, i32) {
    %c0_i32 = arith.constant 0 : i32
    %c0_i32_0 = arith.constant 0 : i32
    %c0_i32_1 = arith.constant 0 : i32
    return %c0_i32, %c0_i32_0 : i32, i32
  }
  func.func @transform_6(%arg0: i32, %arg1: i32) -> (i32, i32, i32) {
    %c0_i32 = arith.constant 0 : i32
    %c0_i32_0 = arith.constant 0 : i32
    %c0_i32_1 = arith.constant 0 : i32
    return %arg0, %c0_i32, %c0_i32_0 : i32, i32, i32
  }
}

</mosaic_0001>

<bundles_post_ra>
// kernel: tpu_custom_call.1
= control target key start
LH: loop header
LB: loop body
LE: loop exit
PB: predicated region body
PF: predicated region fallthrough
CT: control target
= control target key end

     0   :  { %11 = vsyncpa [#allocation3], 0  ;;  %s1794_s0 = inlined_call_operand.vmem [shape: bf16[2,24,3], index: 0, kind: input, shape index: {}]   ;;  %s1795_s1 = inlined_call_operand.vmem [shape: f32[3,64], index: 1, kind: input, shape index: {}]   ;;  %s1796_s2 = inlined_call_operand.vmem [shape: f32[1,64], index: 2, kind: input, shape index: {}]   ;;  %s1797_s3 = inlined_call_operand.vmem [shape: bf16[64,128], index: 3, kind: input, shape index: {}]   ;;  %s1798_s4 = inlined_call_operand.vmem [shape: f32[1,128], index: 4, kind: input, shape index: {}]   ;;  %s1799_s5 = inlined_call_operand.hbm [shape: bf16[128,1024], index: 5, kind: input, shape index: {}]   ;;  %s1800_s6 = inlined_call_operand.hbm [shape: f32[2,1,1024], index: 6, kind: output, shape index: {}]  }
   0x1   :  { %12 = vsyncpa [#allocation4], 0 }
   0x2   :  { %14 = vsyncpa [#allocation4 + $0x1], 0  ;;  %s1565_s21 = smov 0   ;;  %s1567_s22 = smov 0  }
   0x3   :  { %s1569_s23 = smov 0   ;;  %s1571_s24 = smov 0  }
   0x4   :  { %s1573_s25 = smov 0   ;;  %s1575_s26 = smov 0  }
   0x5   :  { %s1577_s27 = smov 0   ;;  %s1579_s28 = smov 0  }
   0x6 LB: > { %s1184_s29 = sadd.s32 4294967295, %s1517_s28   ;;  %s1185_s30 = sadd.s32 4294967294, %s1517_s28   ;;  %s1517_s28 = sphi %s1579_s28, %s20_s28   ;;  %s1513_s27 = sphi %s1577_s27, %s1823_s27   ;;  %s1509_s26 = sphi %s1575_s26, %s1822_s26   ;;  %s1505_s25 = sphi %s1573_s25, %s1821_s25   ;;  %s1501_s24 = sphi %s1571_s24, %s1820_s24   ;;  %s1497_s23 = sphi %s1569_s23, %s1819_s23   ;;  %s1493_s22 = sphi %s1567_s22, %s1818_s22   ;;  %s1489_s21 = sphi %s1565_s21, %s1817_s21  }
   0x7   : > { %s29_s7 = sadd.s32 1, %s1509_s26  ;;  %s32_s8 = sadd.s32 1, %s1513_s27 }
   0x8   : > { %p30_p0 = scmp.ge.s32.totalorder %s29_s7, 3  ;;  %s172_s9 = sadd.s32 1, %s1497_s23 }
   0x9   : > { %p182_p1 = scmp.ne.s32.totalorder %s1497_s23, %s1493_s22  ;;  %p183_p2 = scmp.eq.s32.totalorder %s1184_s29, 5 }
   0xa   : > { %s1825_s7 = smov (%p30_p0, %s29_s7), 0  ;;  %s1827_s8 = smov (!%p30_p0, %s32_s8), %s1513_s27 }
   0xb   : > { %p1615_p3 = por %p183_p2, %p182_p1  ;;  %p188_p4 = scmp.ne.s32.totalorder %s1493_s22, %s1489_s21 }
   0xc   : > { %p34_p5 = scmp.ge.s32.totalorder %s1827_s8, 2  ;;  %p189_p6 = scmp.eq.s32.totalorder %s1185_s30, 5 }
   0xd   : > { %s1806_s10 = scalar_select %p1615_p3, 1, 0 }
   0xe   : > { %p1186_p7 = scmp.ge.s32.totalorder %s1517_s28, 1  ;;  %p196_p8 = scmp.lt.s32.totalorder %s1517_s28, 7 }
   0xf   : > { %s1829_s8 = smov (%p34_p5, %s1827_s8), 0  ;;  %p1625_p9 = por %p189_p6, %p188_p4 }
  0x10   : > { %1807 = sst [smem:[#allocation8_spill]] %s1829_s8  ;;  %p1629_p10 = pnand %p1186_p7, %p196_p8 }
  0x11   : > { %s1808_s11 = scalar_select %p1625_p9, 1, 0 }
  0x12   : > { %s1809_s12 = scalar_select %p1629_p10, 1, 0 }
  0x13   : > { %s169_s13 = ssub.s32 %s1513_s27, %s1829_s8  ;;  %p1298_p12 = pneg %p1629_p10 }
  0x14   : > { %p170_p11 = scmp.eq.s32.totalorder %s169_s13, 0  ;;  %p1637_p13 = scmp.eq.s32.totalorder %s1184_s29, 0 }
  0x15   : > { %s1519_s16 = smov [#allocation2]   ;;  %s1391_s30 = scalar_lea.hbm %s1799_s5, 8192 }
  0x16   : > { %s1810_s14 = scalar_select %p1637_p13, 1, 0 }
  0x17   : > { %s1642_s15 = scalar_select %p170_p11, %s1497_s23, %s172_s9  }
  0x18   : > { %s220_s17 = sshll.u32 %s1519_s16, 4  ;;  %p1646_p0 = pnand %p1637_p13, %p1298_p12  ;;  %s221_s17 = int_to_ptr.vmem [resolvable:$true] %s220_s17 }
  0x19   : > { %p1392_p1 = scmp.ne.s32.totalorder %s1799_s5, %s1391_s30  ;;  %p1398_p6 = scmp.lt.u32.totalorder %s1391_s30, %s1799_s5 }
  0x1a   : > { %p1393_p2 = pneg %p1646_p0 }
  0x1c   : > { %p1394_p4 = pnand %p1393_p2, %p1392_p1 }
  0x1e   : > { %p1395_p5 = pneg %p1394_p4 }
  0x20   : > { %p1400_p7 = pnand %p1398_p6, %p1395_p5 }
  0x22   : > { %1403 = shalt.err (!%p1400_p7)
}
  0x23   : > { %s1404_s8 = scalar_lea.vmem %s221_s17, 8192  ;;  %p1412_p9 = scmp.lt.s32.totalorder %s221_s17, %s221_s17 }
  0x24   : > { %p1405_p8 = scmp.ne.s32.totalorder %s221_s17, %s1404_s8  ;;  %p1413_p3 = scmp.lt.s32.totalorder %s1404_s8, %s1404_s8 }
  0x26   : > { %p1407_p11 = pnand %p1405_p8, %p1393_p2  ;;  %p1414_p13 = por %p1413_p3, %p1412_p9 }
  0x28   : > { %p1408_p12 = pneg %p1407_p11 }
  0x2a   : > { %p1415_p10 = pnand %p1414_p13, %p1408_p12 }
  0x2c   : > { %1418 = shalt.err (!%p1415_p10)
}
  0x2d   : > { %s1520_s19 = smov 512   ;;  %s1521_s20 = smov 32  }
  0x2e   : > { %1301 = dma.hbm_to_vmem [thread:$0]  (!%p1646_p0), %s1799_s5, 8192, %s221_s17, [#allocation3], %s1520_s19, %s1520_s19, %s1521_s20  }
  0x2f   : > { %p1812_p1 = scmp.ne.s32.totalorder %s1809_s12, 0 }
  0x30   : > { %p1813_p4 = scmp.ne.s32.totalorder (!%p1812_p1), %s1810_s14, 0 }
  0x31   : > { %247 = sbr.rel (%p1812_p1) target bundleno = 720 (0x2d0), region = 44 }
  0x38   : > { %1480 = dma.done.wait (%p1813_p4), [#allocation3], 8192  }
  0x39   : > { %1482 = vsyncadd (%p1813_p4), [#allocation3], 4294959104  ;;  %s277_s8 = sand.u32 1, %s1493_s22   ;;  %p280_p3 = scmp.lt.s32.totalorder %s1505_s25, 1 }
  0x3a   : > { %s1191_s18 = sshll.u32 %s277_s8, 3  ;;  %p282_p9 = scmp.lt.s32.totalorder %s1501_s24, 2 }
  0x3b   : > { %s281_s17 = scalar_select %p280_p3, %s1505_s25, 1 }
  0x3c   : > { %s283_s12 = scalar_select %p282_p9, %s1501_s24, 2 }
  0x3d   : > { %s1291_s30 = smul.u32 3, %s281_s17  ;;  %s1682_s29 = scalar_lea.vmem [#allocation5], %s1191_s18 }
  0x3e   : > { %p1193_p10 = scmp.ne.s32.totalorder %s1501_s24, 0 }
  0x3f   : > { %s285_s9 = sadd.s32 %s1291_s30, %s283_s12  ;;  %v1522_v0 = vmov (!%p1193_p10), -inf  }
  0x40   : > { %s1192_s16 = sshll.u32 %s285_s9, 2  ;;  %292 = sbr.rel (%p1193_p10) target bundleno = 71 (0x47), region = 52  ;;  %293 = vst [vmem:[%s1682_s29] sm:$0xff] (!%p1193_p10), %v1522_v0 }
  0x41   : > { %s287_s14 = scalar_lea.vmem %s1794_s0, %s1192_s16 }
  0x47 PF: > { %v294_v1 = vld [vmem:[%s287_s14] sm:$0xf]  ;;  %v1523_v2 = vmov 0   ;;  %v1524_v4 = vmov 2   ;;  %v1525_v6 = vmov 0.0   ;;  %v1526_v7 = vmov 1  }
  0x48   : > { %1383 = vset.pattern.permute.xlu0 %v1523_v2  ;;  %v295_v3 = vunpack.c.l.bf16 %v294_v1  ;;  %1385 = vset.pattern.permute.xlu1 %v1524_v4  ;;  %v1387_v5 = vld [vmem:[%s1797_s3] sm:$0xff]   ;;  %v1388_v8 = vld [vmem:[%s1797_s3 + $0x8] sm:$0xff]   ;;  %v1389_v9 = vld [vmem:[%s1797_s3 + $0x10] sm:$0xff]   ;;  %vm1527_vm0 = vmmov 0   ;;  %vm378_vm1 = vcmask 523264   ;;  %s1273_s16 = sshll.u32 %s1505_s25, 7 }
  0x49   : > { %840 = vmatprep.mubr.bf16.mxu1 %v1523_v2  ;;  %1279 = vmatprep.subr.bf16.mxu0 %v1525_v6  ;;  %v1390_v10 = vld [vmem:[%s1797_s3 + $0x18] sm:$0xff]   ;;  %v424_v11 = vld [vmem:[#allocation2] sm:$0xff]  ;;  %v1700_v13 = vld [vmem:[#allocation2 + $0x8] sm:$0xff]  ;;  %s1096_s19 = sshll.u32 %s1682_s29, 4  ;;  %s1738_s13 = scalar_lea.hbm %s1800_s6, %s1273_s16  ;;  %s1740_s19 = int_to_ptr.vmem [resolvable:$true] %s1096_s19 }
  0x4a   : > { %299 = vperm.xlu0 %1383, %v295_v3   ;;  %320 = vperm.xlu1 %1385, %v295_v3   ;;  %v428_v12 = vld [vmem:[#allocation2 + $0x20] sm:$0xff]  ;;  %v1702_v15 = vld [vmem:[#allocation2 + $0x28] sm:$0xff]  ;;  %s1082_s18 = scalar_lea.sflag [#allocation4], %s277_s8  ;;  %s1419_s24 = scalar_lea.vmem %s1740_s19, 128 }
  0x4b   : > { %1280 = vmatpush3.bf16.msra.mxu0 %v1387_v5  ;;  %1287 = vmatprep.mubr.msk.bf16.mxu0 %vm1527_vm0, %v1525_v6  ;;  %v1205_v14 = vcombine.high %v424_v11, %v428_v12  ;;  %v1204_v16 = vcombine.low %v424_v11, %v428_v12  ;;  %v432_v17 = vld [vmem:[#allocation2 + $0x40] sm:$0xff]  ;;  %v1206_v19 = vcombine.low %v1700_v13, %v1702_v15  ;;  %v433_v56 = vld [vmem:[#allocation2 + $0x48] sm:$0xff]  ;;  %p1420_p13 = scmp.ne.s32.totalorder %s1740_s19, %s1419_s24  ;;  %p1814_p0 = scmp.ne.s32.totalorder %s1806_s10, 0 }
  0x4c   : > { %1281 = vmatprep.subr.bf16.mxu0 %v1525_v6  ;;  %v436_v18 = vld [vmem:[#allocation2 + $0x60] sm:$0xff]  ;;  %v1207_v20 = vcombine.high %v1700_v13, %v1702_v15  ;;  %v437_v57 = vld [vmem:[#allocation2 + $0x68] sm:$0xff]  ;;  %s1529_s25 = smov [#allocation5]  }
  0x4d   : > { %v1213_v21 = vcombine.high %v432_v17, %v436_v18  ;;  %808 = vmatprep.subr.bf16.mxu1 %v1205_v14  ;;  %v1212_v22 = vcombine.low %v432_v17, %v436_v18  ;;  %v440_v23 = vld [vmem:[#allocation2 + $0x80] sm:$0xff]  ;;  %v1215_v60 = vcombine.high %v433_v56, %v437_v57  ;;  %v441_v61 = vld [vmem:[#allocation2 + $0x88] sm:$0xff]  ;;  %v1214_v63 = vcombine.low %v433_v56, %v437_v57  ;;  %v450_v57 = vld [vmem:[#allocation2 + $0xd0] sm:$0xff]  ;;  %p1421_p2 = pnand %p1420_p13, %p1814_p0  ;;  %s1423_s17 = sshll.u32 %s1529_s25, 4  ;;  %s1424_s17 = int_to_ptr.vmem [resolvable:$false] %s1423_s17 }
  0x4e   : > { %1384 = vset.pattern.permute.xlu0 %v1526_v7  ;;  %809 = vmatpush1.bf16.msra.mxu1 %v1204_v16  ;;  %v444_v24 = vld [vmem:[#allocation2 + $0xa0] sm:$0xff]  ;;  %v445_v62 = vld [vmem:[#allocation2 + $0xa8] sm:$0xff]  ;;  %s1425_s12 = scalar_lea.vmem %s1424_s17, 256  ;;  %p1426_p6 = scmp.lt.s32.totalorder %s1740_s19, %s1424_s17 }
  0x4f   : > { %309 = vperm.xlu0 %1384, %v295_v3   ;;  %1282 = vmatpush3.bf16.msra.mxu0 %v1388_v8  ;;  %v1221_v25 = vcombine.high %v440_v23, %v444_v24  ;;  %v1220_v26 = vcombine.low %v440_v23, %v444_v24  ;;  %v448_v27 = vld [vmem:[#allocation2 + $0xc0] sm:$0xff]  ;;  %v1223_v0 = vcombine.high %v441_v61, %v445_v62  ;;  %v449_v1 = vld [vmem:[#allocation2 + $0xc8] sm:$0xff]  ;;  %p1422_p5 = pneg %p1421_p2  ;;  %p1427_p7 = scmp.lt.s32.totalorder %s1425_s12, %s1419_s24 }
  0x50   : > { %1283 = vmatprep.subr.bf16.mxu0 %v1525_v6  ;;  %810 = vmatprep.subr.bf16.mxu1 %v1213_v21  ;;  %v452_v28 = vld [vmem:[#allocation2 + $0xe0] sm:$0xff]  ;;  %v453_v3 = vld [vmem:[#allocation2 + $0xe8] sm:$0xff] }
  0x51   : > { %v1229_v29 = vcombine.high %v448_v27, %v452_v28  ;;  %v1228_v30 = vcombine.low %v448_v27, %v452_v28  ;;  %v456_v31 = vld [vmem:[#allocation2 + $0x100] sm:$0xff]  ;;  %v1231_v5 = vcombine.high %v449_v1, %v453_v3  ;;  %v461_v7 = vld [vmem:[#allocation2 + $0x128] sm:$0xff]  ;;  %v1230_v8 = vcombine.low %v449_v1, %v453_v3  ;;  %v426_v27 = vld [vmem:[#allocation2 + $0x10] sm:$0xff]  ;;  %p1428_p8 = por %p1427_p7, %p1426_p6 }
  0x52   : > { %811 = vmatpush1.bf16.msra.mxu1 %v1212_v22  ;;  %v460_v32 = vld [vmem:[#allocation2 + $0x120] sm:$0xff]  ;;  %v469_v11 = vld [vmem:[#allocation2 + $0x168] sm:$0xff]  ;;  %v430_v28 = vld [vmem:[#allocation2 + $0x30] sm:$0xff] }
  0x53   : > { %1386 = vset.pattern.permute.xlu0 %v1524_v4  ;;  %1284 = vmatpush3.bf16.msra.mxu0 %v1389_v9  ;;  %v1237_v33 = vcombine.high %v456_v31, %v460_v32  ;;  %v1236_v34 = vcombine.low %v456_v31, %v460_v32  ;;  %v464_v35 = vld [vmem:[#allocation2 + $0x140] sm:$0xff]  ;;  %v1222_v4 = vcombine.low %v441_v61, %v445_v62  ;;  %v473_v14 = vld [vmem:[#allocation2 + $0x188] sm:$0xff]  ;;  %v431_v31 = vld [vmem:[#allocation2 + $0x38] sm:$0xff]  ;;  %p1429_p11 = pnand %p1428_p8, %p1422_p5 }
  0x54   : > { %1285 = vmatprep.subr.bf16.mxu0 %v1525_v6  ;;  %812 = vmatprep.subr.bf16.mxu1 %v1221_v25  ;;  %v468_v36 = vld [vmem:[#allocation2 + $0x160] sm:$0xff]  ;;  %v457_v6 = vld [vmem:[#allocation2 + $0x108] sm:$0xff]  ;;  %v1208_v32 = vcombine.low %v426_v27, %v430_v28  ;;  %v458_v1 = vld [vmem:[#allocation2 + $0x110] sm:$0xff] }
  0x55   : > { %v1245_v37 = vcombine.high %v464_v35, %v468_v36  ;;  %v1244_v38 = vcombine.low %v464_v35, %v468_v36  ;;  %v472_v39 = vld [vmem:[#allocation2 + $0x180] sm:$0xff]  ;;  %v1239_v9 = vcombine.high %v457_v6, %v461_v7  ;;  %v1238_v12 = vcombine.low %v457_v6, %v461_v7  ;;  %v477_v15 = vld [vmem:[#allocation2 + $0x1a8] sm:$0xff]  ;;  %v462_v3 = vld [vmem:[#allocation2 + $0x130] sm:$0xff] }
  0x56   : > { %813 = vmatpush1.bf16.msra.mxu1 %v1220_v26  ;;  %v476_v40 = vld [vmem:[#allocation2 + $0x1a0] sm:$0xff]  ;;  %v1255_v17 = vcombine.high %v473_v14, %v477_v15  ;;  %v1254_v18 = vcombine.low %v473_v14, %v477_v15  ;;  %v481_v21 = vld [vmem:[#allocation2 + $0x1c8] sm:$0xff] }
  0x57   : > { %1286 = vmatpush3.bf16.msra.mxu0 %v1390_v10  ;;  %814 = vmatprep.subr.bf16.mxu1 %v1229_v29  ;;  %v1253_v41 = vcombine.high %v472_v39, %v476_v40  ;;  %v1252_v42 = vcombine.low %v472_v39, %v476_v40  ;;  %v1194_v44 = vld [vmem:[%s1795_s1] ss:$0 sm:$0xff]  ;;  %v1195_v45 = vld [vmem:[%s1795_s1 + $0x1] ss:$0 sm:$0xff]  ;;  %v1196_v46 = vld [vmem:[%s1795_s1 + $0x2] ss:$0 sm:$0xff] }
  0x58   : > { %849 = vmatprep.subr.bf16.mxu0 %v1207_v20  ;;  %v1197_v53 = vld [vmem:[%s1796_s2] ss:$0 sm:$0xff]  ;;  %v465_v10 = vld [vmem:[#allocation2 + $0x148] sm:$0xff]  ;;  %v427_v29 = vld [vmem:[#allocation2 + $0x18] sm:$0xff] }
  0x59   : > { %v1247_v13 = vcombine.high %v465_v10, %v469_v11  ;;  %v1246_v16 = vcombine.low %v465_v10, %v469_v11  ;;  %v484_v20 = vld [vmem:[#allocation2 + $0x1e0] sm:$0xff]  ;;  %v485_v23 = vld [vmem:[#allocation2 + $0x1e8] sm:$0xff]  ;;  %v434_v39 = vld [vmem:[#allocation2 + $0x50] sm:$0xff] }
  0x5a   : > { %815 = vmatpush1.bf16.msra.mxu1 %v1228_v30  ;;  %v1262_v24 = vcombine.low %v481_v21, %v485_v23  ;;  %v1263_v25 = vcombine.high %v481_v21, %v485_v23  ;;  %v1209_v30 = vcombine.high %v426_v27, %v430_v28  ;;  %v1198_v35 = vld [vmem:[%s1798_s4] ss:$0 sm:$0xff]  ;;  %v470_v10 = vld [vmem:[#allocation2 + $0x170] sm:$0xff]  ;;  %v467_v11 = vld [vmem:[#allocation2 + $0x158] sm:$0xff] }
  0x5b   : > { %816 = vmatprep.subr.bf16.mxu1 %v1237_v33  ;;  %v1210_v33 = vcombine.low %v427_v29, %v431_v31  ;;  %v483_v27 = vld [vmem:[#allocation2 + $0x1d8] sm:$0xff] }
  0x5c   : > { %v487_v28 = vld [vmem:[#allocation2 + $0x1f8] sm:$0xff] }
  0x5e   : > { %817 = vmatpush1.bf16.msra.mxu1 %v1236_v34  ;;  %v1211_v34 = vcombine.high %v427_v29, %v431_v31 }
  0x5f   : > { %818 = vmatprep.subr.bf16.mxu1 %v1245_v37 }
  0x62   : > { %819 = vmatpush1.bf16.msra.mxu1 %v1244_v38 }
  0x63   : > { %820 = vmatprep.subr.bf16.mxu1 %v1253_v41  ;;  %v438_v41 = vld [vmem:[#allocation2 + $0x70] sm:$0xff] }
  0x66   : > { %821 = vmatpush1.bf16.msra.mxu1 %v1252_v42  ;;  %v435_v42 = vld [vmem:[#allocation2 + $0x58] sm:$0xff] }
  0xc9   : > { %v300_v43 = vpop.permute.xlu0 %299  ;;  %v321_v47 = vpop.permute.xlu1 %320 }
  0xca   : > { %v306_v49 = vmul.f32 %v1194_v44, %v300_v43  ;;  %v327_v51 = vmul.f32 %v1196_v46, %v321_v47  ;;  %v439_v43 = vld [vmem:[#allocation2 + $0x78] sm:$0xff]  ;;  %v1217_v47 = vcombine.high %v434_v39, %v438_v41 }
  0xce   : > { %v310_v48 = vpop.permute.xlu0 %309 }
  0xcf   : > { %v316_v50 = vmul.f32 %v1195_v45, %v310_v48  ;;  %v1219_v48 = vcombine.high %v435_v42, %v439_v43 }
  0xd1   : > { %v317_v52 = vadd.f32 %v316_v50, %v306_v49  ;;  %v442_v49 = vld [vmem:[#allocation2 + $0x90] sm:$0xff] }
  0xd2   : > { %v446_v50 = vld [vmem:[#allocation2 + $0xb0] sm:$0xff] }
  0xd3   : > { %v328_v54 = vadd.f32 %v327_v51, %v317_v52  ;;  %v443_v51 = vld [vmem:[#allocation2 + $0x98] sm:$0xff]  ;;  %v1224_v61 = vcombine.low %v442_v49, %v446_v50 }
  0xd4   : > { %v447_v52 = vld [vmem:[#allocation2 + $0xb8] sm:$0xff] }
  0xd5   : > { %v336_v55 = vadd.f32 %v1197_v53, %v328_v54  ;;  %v1216_v53 = vcombine.low %v434_v39, %v438_v41  ;;  %v1218_v54 = vcombine.low %v435_v42, %v439_v43  ;;  %v1227_v56 = vcombine.high %v443_v51, %v447_v52 }
  0xd6   : > { %v1226_v62 = vcombine.low %v443_v51, %v447_v52  ;;  %v1528_v51 = vmov 1966171168  }
  0xd7   : > { %v337_v58 = vmax.f32 %v336_v55, 0.0  ;;  %v1225_v55 = vcombine.high %v442_v49, %v446_v50  ;;  %v1034_v52 = vunpack.c.l.s4 %v1528_v51 }
  0xd9   : > { %v338_v59 = vpack.c.bf16 %v337_v58, %v337_v58  ;;  %v454_v58 = vld [vmem:[#allocation2 + $0xf0] sm:$0xff] }
  0xda   : > { %v1232_v6 = vcombine.low %v450_v57, %v454_v58 }
  0xdb   : > { %1288 = vmatmul.mubr.msk.bf16.vlgmr.msra.gmra.mrb[0].mxu0 %vm378_vm1, %v338_v59  ;;  %v451_v59 = vld [vmem:[#allocation2 + $0xd8] sm:$0xff] }
  0xdc   : > { %850 = vmatpush1.bf16.msra.mxu0 %v1206_v19  ;;  %881 = vmatprep.mubr.bf16.mxu0 %v1523_v2  ;;  %v480_v19 = vld [vmem:[#allocation2 + $0x1c0] sm:$0xff] }
  0xdd   : > { %851 = vmatprep.subr.bf16.mxu0 %v1215_v60  ;;  %v1261_v22 = vcombine.high %v480_v19, %v484_v20  ;;  %v1260_v26 = vcombine.low %v480_v19, %v484_v20  ;;  %v455_v60 = vld [vmem:[#allocation2 + $0xf8] sm:$0xff] }
  0xde   : > { %v1234_v7 = vcombine.low %v451_v59, %v455_v60  ;;  %v475_v19 = vld [vmem:[#allocation2 + $0x198] sm:$0xff] }
  0xdf   : > { %822 = vmatprep.subr.bf16.mxu1 %v1261_v22  ;;  %v479_v20 = vld [vmem:[#allocation2 + $0x1b8] sm:$0xff] }
  0xe0   : > { %852 = vmatpush1.bf16.msra.mxu0 %v1214_v63  ;;  %823 = vmatpush1.bf16.msra.mxu1 %v1260_v26  ;;  %v1233_v63 = vcombine.high %v450_v57, %v454_v58  ;;  %v486_v26 = vld [vmem:[#allocation2 + $0x1f0] sm:$0xff] }
  0xe1   : > { %853 = vmatprep.subr.bf16.mxu0 %v1223_v0  ;;  %890 = vmatprep.subr.bf16.mxu1 %v1209_v30  ;;  %v1235_v0 = vcombine.high %v451_v59, %v455_v60  ;;  %v1258_v30 = vcombine.low %v475_v19, %v479_v20 }
  0xe4   : > { %854 = vmatpush1.bf16.msra.mxu0 %v1222_v4  ;;  %v459_v4 = vld [vmem:[#allocation2 + $0x118] sm:$0xff] }
  0xe5   : > { %855 = vmatprep.subr.bf16.mxu0 %v1231_v5  ;;  %v463_v5 = vld [vmem:[#allocation2 + $0x138] sm:$0xff] }
  0xe6   : > { %v1242_v14 = vcombine.low %v459_v4, %v463_v5 }
  0xe8   : > { %856 = vmatpush1.bf16.msra.mxu0 %v1230_v8  ;;  %v1241_v8 = vcombine.high %v458_v1, %v462_v3 }
  0xe9   : > { %857 = vmatprep.subr.bf16.mxu0 %v1239_v9  ;;  %v466_v9 = vld [vmem:[#allocation2 + $0x150] sm:$0xff] }
  0xea   : > { %v1249_v15 = vcombine.high %v466_v9, %v470_v10  ;;  %v1248_v21 = vcombine.low %v466_v9, %v470_v10 }
  0xec   : > { %858 = vmatpush1.bf16.msra.mxu0 %v1238_v12  ;;  %v471_v12 = vld [vmem:[#allocation2 + $0x178] sm:$0xff] }
  0xed   : > { %859 = vmatprep.subr.bf16.mxu0 %v1247_v13  ;;  %v1240_v13 = vcombine.low %v458_v1, %v462_v3  ;;  %v1250_v22 = vcombine.low %v467_v11, %v471_v12 }
  0xf0   : > { %860 = vmatpush1.bf16.msra.mxu0 %v1246_v16  ;;  %v1251_v16 = vcombine.high %v467_v11, %v471_v12 }
  0xf1   : > { %861 = vmatprep.subr.bf16.mxu0 %v1255_v17  ;;  %v474_v17 = vld [vmem:[#allocation2 + $0x190] sm:$0xff] }
  0xf4   : > { %862 = vmatpush1.bf16.msra.mxu0 %v1254_v18  ;;  %v478_v18 = vld [vmem:[#allocation2 + $0x1b0] sm:$0xff] }
  0xf5   : > { %863 = vmatprep.subr.bf16.mxu0 %v1263_v25  ;;  %v1257_v23 = vcombine.high %v474_v17, %v478_v18  ;;  %v482_v25 = vld [vmem:[#allocation2 + $0x1d0] sm:$0xff]  ;;  %v1256_v29 = vcombine.low %v474_v17, %v478_v18 }
  0xf6   : > { %v1265_v31 = vcombine.high %v482_v25, %v486_v26 }
  0xf8   : > { %864 = vmatpush1.bf16.msra.mxu0 %v1262_v24  ;;  %v1259_v24 = vcombine.high %v475_v19, %v479_v20 }
  0xf9   : > { %931 = vmatprep.subr.bf16.mxu0 %v1211_v34  ;;  %v1266_v34 = vcombine.low %v483_v27, %v487_v28 }
 0x1ae   : > { %v416_v36 = vpop.f32.mrb[0].mxu0 }
 0x1af   : > { %v417_v37 = vadd.f32 %v1198_v35, %v416_v36  ;;  %v1289_v38 = vpop.f32.mrb[1].mxu0 }
 0x1b0   : > { %v419_v40 = vpop.f32.mrb[2].mxu0 }
 0x1b1   : > { %v422_v44 = vmax.f32 %v417_v37, 0.0  ;;  %v1290_v45 = vpop.f32.mrb[3].mxu0 }
 0x1b3   : > { %v1724_v46 = vpack.c.bf16 %v422_v44, %v422_v44 }
 0x1b5   : > { %841 = vmatmul.mubr.bf16.vlgmr.msra.gmra.mrb[0].mxu1 %v1724_v46  ;;  %882 = vmatmul.mubr.bf16.vlgmr.msra.gmra.mrb[4].mxu0 %v1724_v46 }
 0x1b6   : > { %891 = vmatpush1.bf16.msra.mxu1 %v1208_v32  ;;  %932 = vmatpush1.bf16.msra.mxu0 %v1210_v33  ;;  %v1267_v32 = vcombine.high %v483_v27, %v487_v28  ;;  %v1264_v33 = vcombine.low %v482_v25, %v486_v26 }
 0x1b7   : > { %892 = vmatprep.subr.bf16.mxu1 %v1217_v47  ;;  %933 = vmatprep.subr.bf16.mxu0 %v1219_v48 }
 0x1b8   : > { %922 = vmatprep.mubr.bf16.mxu1 %v1523_v2  ;;  %963 = vmatprep.mubr.bf16.mxu0 %v1523_v2  ;;  %v1243_v2 = vcombine.high %v459_v4, %v463_v5 }
 0x1ba   : > { %893 = vmatpush1.bf16.msra.mxu1 %v1216_v53  ;;  %934 = vmatpush1.bf16.msra.mxu0 %v1218_v54  ;;  %v1036_v53 = vlaneseq }
 0x1bb   : > { %894 = vmatprep.subr.bf16.mxu1 %v1225_v55  ;;  %935 = vmatprep.subr.bf16.mxu0 %v1227_v56 }
 0x1be   : > { %895 = vmatpush1.bf16.msra.mxu1 %v1224_v61  ;;  %936 = vmatpush1.bf16.msra.mxu0 %v1226_v62  ;;  %v1035_v61 = vunpack.c.0.s8 %v1034_v52  ;;  %v1037_v62 = vshrl.u32 %v1036_v53, 7 }
 0x1bf   : > { %896 = vmatprep.subr.bf16.mxu1 %v1233_v63  ;;  %937 = vmatprep.subr.bf16.mxu0 %v1235_v0 }
 0x1c2   : > { %897 = vmatpush1.bf16.msra.mxu1 %v1232_v6  ;;  %938 = vmatpush1.bf16.msra.mxu0 %v1234_v7 }
 0x1c3   : > { %898 = vmatprep.subr.bf16.mxu1 %v1241_v8  ;;  %939 = vmatprep.subr.bf16.mxu0 %v1243_v2  ;;  %v1038_v8 = vsub.s32 %v1035_v61, %v1037_v62 }
 0x1c6   : > { %899 = vmatpush1.bf16.msra.mxu1 %v1240_v13  ;;  %940 = vmatpush1.bf16.msra.mxu0 %v1242_v14 }
 0x1c7   : > { %900 = vmatprep.subr.bf16.mxu1 %v1249_v15  ;;  %941 = vmatprep.subr.bf16.mxu0 %v1251_v16 }
 0x1ca   : > { %901 = vmatpush1.bf16.msra.mxu1 %v1248_v21  ;;  %942 = vmatpush1.bf16.msra.mxu0 %v1250_v22 }
 0x1cb   : > { %902 = vmatprep.subr.bf16.mxu1 %v1257_v23  ;;  %943 = vmatprep.subr.bf16.mxu0 %v1259_v24 }
 0x1ce   : > { %903 = vmatpush1.bf16.msra.mxu1 %v1256_v29  ;;  %944 = vmatpush1.bf16.msra.mxu0 %v1258_v30 }
 0x1cf   : > { %904 = vmatprep.subr.bf16.mxu1 %v1265_v31  ;;  %945 = vmatprep.subr.bf16.mxu0 %v1267_v32 }
 0x1d2   : > { %905 = vmatpush1.bf16.msra.mxu1 %v1264_v33  ;;  %946 = vmatpush1.bf16.msra.mxu0 %v1266_v34 }
 0x1d5   : > { %923 = vmatmul.mubr.bf16.vlgmr.msra.gmra.mrb[4].mxu1 %v1724_v46  ;;  %964 = vmatmul.mubr.bf16.vlgmr.msra.gmra.mrb[8].mxu0 %v1724_v46 }
 0x288   : > { %v842_v35 = vpop.f32.mrb[0].mxu1  ;;  %v883_v36 = vpop.f32.mrb[4].mxu0 }
 0x289   : > { %v973_v37 = vrot.slane %v842_v35, 4  ;;  %v985_v38 = vrot.slane %v883_v36, 4  ;;  %v844_v39 = vpop.f32.mrb[1].mxu1  ;;  %v885_v40 = vpop.f32.mrb[5].mxu0 }
 0x28a   : > { %v979_v41 = vrot.slane %v844_v39, 4  ;;  %v991_v42 = vrot.slane %v885_v40, 4  ;;  %v846_v43 = vpop.f32.mrb[2].mxu1  ;;  %v887_v44 = vpop.f32.mrb[6].mxu0 }
 0x28b   : > { %v974_v45 = vmax.f32 %v842_v35, %v973_v37  ;;  %v986_v47 = vmax.f32 %v883_v36, %v985_v38  ;;  %v847_v48 = vpop.f32.mrb[3].mxu1  ;;  %v888_v49 = vpop.f32.mrb[7].mxu0 }
 0x28c   : > { %v980_v50 = vmax.f32 %v844_v39, %v979_v41  ;;  %v992_v54 = vmax.f32 %v885_v40, %v991_v42 }
 0x28d   : > { %v975_v46 = vrot.slane %v974_v45, 2  ;;  %v987_v55 = vrot.slane %v986_v47, 2 }
 0x28e   : > { %v981_v56 = vrot.slane %v980_v50, 2  ;;  %v993_v57 = vrot.slane %v992_v54, 2 }
 0x28f   : > { %v976_v58 = vmax.f32 %v974_v45, %v975_v46  ;;  %v988_v59 = vmax.f32 %v986_v47, %v987_v55 }
 0x290   : > { %v982_v60 = vmax.f32 %v980_v50, %v981_v56  ;;  %v994_v63 = vmax.f32 %v992_v54, %v993_v57  ;;  %v972_v54 = vld [vmem:[%s1682_s29] sm:$0xff] }
 0x291   : > { %v977_v0 = vrot.slane %v976_v58, 1  ;;  %v989_v1 = vrot.slane %v988_v59, 1 }
 0x292   : > { %v983_v3 = vrot.slane %v982_v60, 1  ;;  %v995_v4 = vrot.slane %v994_v63, 1 }
 0x293   : > { %v978_v5 = vmax.f32 %v976_v58, %v977_v0  ;;  %v990_v6 = vmax.f32 %v988_v59, %v989_v1 }
 0x294   : > { %v984_v7 = vmax.f32 %v982_v60, %v983_v3  ;;  %v996_v2 = vmax.f32 %v994_v63, %v995_v4 }
 0x296   : > { %v1029_v9 = vcombine.low %v978_v5, %v984_v7  ;;  %v1030_v10 = vcombine.low %v990_v6, %v996_v2 }
 0x298   : > { %v1039_v11 = vrot.slane %v1029_v9, %v1038_v8  ;;  %v1046_v12 = vrot.slane %v1030_v10, %v1038_v8 }
 0x29a   : > { %v1061_v13 = vcombine.low %v1039_v11, %v1046_v12 }
 0x29c   : > { %v1069_v52 = vrot.slane %v1061_v13, %v1038_v8 }
 0x2a8   : > { %v924_v14 = vpop.f32.mrb[4].mxu1  ;;  %v965_v15 = vpop.f32.mrb[8].mxu0 }
 0x2a9   : > { %v997_v16 = vrot.slane %v924_v14, 4  ;;  %v1009_v17 = vrot.slane %v965_v15, 4  ;;  %v926_v18 = vpop.f32.mrb[5].mxu1  ;;  %v967_v19 = vpop.f32.mrb[9].mxu0 }
 0x2aa   : > { %v1003_v20 = vrot.slane %v926_v18, 4  ;;  %v1015_v21 = vrot.slane %v967_v19, 4  ;;  %v928_v22 = vpop.f32.mrb[6].mxu1  ;;  %v969_v23 = vpop.f32.mrb[10].mxu0 }
 0x2ab   : > { %v998_v24 = vmax.f32 %v924_v14, %v997_v16  ;;  %v1010_v25 = vmax.f32 %v965_v15, %v1009_v17  ;;  %v929_v26 = vpop.f32.mrb[7].mxu1  ;;  %v970_v27 = vpop.f32.mrb[11].mxu0 }
 0x2ac   : > { %v1004_v28 = vmax.f32 %v926_v18, %v1003_v20  ;;  %v1016_v29 = vmax.f32 %v967_v19, %v1015_v21 }
 0x2ad   : > { %v999_v30 = vrot.slane %v998_v24, 2  ;;  %v1011_v31 = vrot.slane %v1010_v25, 2 }
 0x2ae   : > { %v1005_v32 = vrot.slane %v1004_v28, 2  ;;  %v1017_v33 = vrot.slane %v1016_v29, 2 }
 0x2af   : > { %v1000_v34 = vmax.f32 %v998_v24, %v999_v30  ;;  %v1012_v35 = vmax.f32 %v1010_v25, %v1011_v31 }
 0x2b0   : > { %v1006_v36 = vmax.f32 %v1004_v28, %v1005_v32  ;;  %v1018_v37 = vmax.f32 %v1016_v29, %v1017_v33 }
 0x2b1   : > { %v1001_v38 = vrot.slane %v1000_v34, 1  ;;  %v1013_v39 = vrot.slane %v1012_v35, 1 }
 0x2b2   : > { %v1007_v40 = vrot.slane %v1006_v36, 1  ;;  %v1019_v41 = vrot.slane %v1018_v37, 1 }
 0x2b3   : > { %v1002_v42 = vmax.f32 %v1000_v34, %v1001_v38  ;;  %v1014_v43 = vmax.f32 %v1012_v35, %v1013_v39 }
 0x2b4   : > { %v1008_v44 = vmax.f32 %v1006_v36, %v1007_v40  ;;  %v1020_v45 = vmax.f32 %v1018_v37, %v1019_v41 }
 0x2b6   : > { %v1031_v47 = vcombine.low %v1002_v42, %v1008_v44  ;;  %v1032_v48 = vcombine.low %v1014_v43, %v1020_v45 }
 0x2b8   : > { %v1053_v49 = vrot.slane %v1031_v47, %v1038_v8  ;;  %v1060_v50 = vrot.slane %v1032_v48, %v1038_v8 }
 0x2ba   : > { %v1062_v51 = vcombine.low %v1053_v49, %v1060_v50 }
 0x2bc   : > { %v1076_v53 = vrot.slane %v1062_v51, %v1038_v8 }
 0x2be   : > { %v1077_v46 = vcombine.low %v1069_v52, %v1076_v53 }
 0x2c0   : > { %v1079_v55 = vmax.f32 %v972_v54, %v1077_v46 }
 0x2c2   : > { %1080 = vst [vmem:[%s1682_s29] sm:$0xff] %v1079_v55 }
 0x2c3   : > { %1432 = shalt.err (!%p1429_p11)
}
 0x2c4   : > { %s1433_s8 = scalar_lea.hbm %s1738_s13, 128  ;;  %s1437_s9 = scalar_lea.hbm %s1800_s6, 256 }
 0x2c5   : > { %p1434_p12 = scmp.ne.s32.totalorder %s1738_s13, %s1433_s8  ;;  %p1438_p3 = scmp.lt.u32.totalorder %s1738_s13, %s1800_s6 }
 0x2c6   : > { %p1439_p9 = scmp.lt.u32.totalorder %s1437_s9, %s1433_s8  ;;  %p1441_p13 = scmp.lt.u32.totalorder %s1433_s8, %s1738_s13 }
 0x2c7   : > { %p1435_p1 = pnand %p1434_p12, %p1814_p0 }
 0x2c8   : > { %p1440_p10 = por %p1439_p9, %p1438_p3 }
 0x2c9   : > { %p1436_p4 = pneg %p1435_p1 }
 0x2ca   : > { %p1442_p2 = por %p1441_p13, %p1440_p10 }
 0x2cc   : > { %p1443_p5 = pnand %p1442_p2, %p1436_p4 }
 0x2ce   : > { %1446 = shalt.err (!%p1443_p5)
}
 0x2cf   : > { %1296 = dma.vmem_to_hbm [thread:$0]  (%p1814_p0), %s1740_s19, 128, %s1738_s13, %s1082_s18  }
 0x2d0 PF: > { %p1308_p6 = scmp.ge.s32.totalorder %s1517_s28, 2  ;;  %s1108_s14 = sand.u32 1, %s1489_s21  }
 0x2d1   : > { %p1815_p7 = scmp.ne.s32.totalorder %s1808_s11, 0  ;;  %s1109_s24 = scalar_lea.sflag [#allocation4], %s1108_s14 }
 0x2d3   : > { %p1303_p8 = pnand %p1308_p6, %p1815_p7 }
 0x2d5   : > { %1484 = dma.done.wait (!%p1303_p8), %s1109_s24, 128  }
 0x2d6   : > { %1486 = vsyncadd (!%p1303_p8), %s1109_s24, 4294967168  ;;  %s20_s28 = sadd.s32 1, %s1517_s28   ;;  %s1816_s10 = sld [smem:[#allocation8_spill]] }
 0x2d7   : > { %p17_p11 = scmp.ge.s32.totalorder %s20_s28, 8   ;;  %s1817_s21 = smov %s1493_s22 }
 0x2d8   : > { %s1818_s22 = smov %s1497_s23  ;;  %s1819_s23 = smov %s1642_s15 }
 0x2d9   : > { %s1820_s24 = smov %s1509_s26  ;;  %s1821_s25 = smov %s1513_s27 }
 0x2da   : > { %s1822_s26 = smov %s1825_s7  ;;  %19 = sbr.rel (!%p17_p11) target bundleno = 6 (0x6), region = 88 }
 0x2dc   : > { %s1823_s27 = smov %s1816_s10 }
 0x2e1   :  { %1114 = vsyncpa [#allocation3], 1 }
 0x2e2   :  { %1116 = vsyncpa [#allocation3 + $0x1], 1 }
 0x2e3   :  { %1117 = vsyncpa [#allocation4], 1 }
 0x2e4   :  { %1119 = vsyncpa [#allocation4 + $0x1], 1 }

</bundles_post_ra>
